<compile_context>
chip_gen: v7x
topology: tpu7x:2x2x1
jax: 0.10.0
libtpu: 0.0.40
codegen_flags: <defaults>
</compile_context>

<pallas_src>
import functools

import jax
import jax.numpy as jnp
from jax.experimental import pallas as pl
from jax.experimental.pallas import tpu as pltpu

LANE = 128
SUBLANE = 8


def _round_up(x, m):
    return (x + m - 1) // m * m


# ----------------------------------------------------------------------------
# Fused MLP kernel. One grid axis over batch tiles.
#   x_ref: (TILE_B, F)  f32   activations (batch on sublanes, padded feats on lanes)
#   w_ref: (L, F, F)    bf16  stacked, zero-padded weights (in, out)
#   b_ref: (L, 1, F)    f32   stacked, zero-padded biases
#   o_ref: (TILE_B, F)  f32   padded output (lane-dense, unmasked store)
# ----------------------------------------------------------------------------
def _mlp_kernel(x_ref, w_ref, b_ref, o_ref, *, num_layers):
    x = x_ref[...]                                            # f32 (TILE_B, F)
    for i in range(num_layers):                               # static unroll
        w = w_ref[i]                                          # bf16 (F, F)
        b = b_ref[i]                                          # f32  (1, F)
        # bf16 MXU inputs, f32 accumulation.
        y = jnp.dot(x.astype(jnp.bfloat16), w,
                    preferred_element_type=jnp.float32) + b
        if i < num_layers - 1:
            x = jnp.maximum(y, 0.0)                           # ReLU on VPU (f32)
        else:
            x = jax.nn.sigmoid(y)                             # exp -> EUP (f32)
    o_ref[...] = x.astype(o_ref.dtype)                        # full-lane store


def neral_net_forward(params, x, *, tile_b=256):
    """Fused NeralNet.forward: relu(Linear)* -> Linear -> sigmoid, one kernel.

    params: list of (W, b) with W shaped (in_features, out_features).
    x:      (batch, in_features) float array.
    """
    B, in0 = x.shape
    num_layers = len(params)
    assert num_layers >= 1 and params[0][0].shape[0] == in0
    out_last = params[-1][0].shape[1]

    # Uniform padded feature width (all feature dims here are <= 128).
    feat_dims = [in0] + [w.shape[1] for (w, _) in params]
    F = max(_round_up(d, LANE) for d in feat_dims)

    # Batch tiling: clamp tile to the (sublane-rounded) batch, pad ragged tail.
    tile_b = max(SUBLANE, min(tile_b, _round_up(B, SUBLANE)))
    B_pad = _round_up(B, tile_b)
    grid = (B_pad // tile_b,)

    # Zero-pad input activations: padded rows/cols contribute nothing and the
    # extra output rows/cols are sliced off below.
    x_pad = jnp.zeros((B_pad, F), jnp.float32).at[:B, :in0].set(
        x.astype(jnp.float32))

    # Pack all layer weights/biases into single padded buffers (fewer DMAs).
    w_stack = jnp.zeros((num_layers, F, F), jnp.bfloat16)
    b_stack = jnp.zeros((num_layers, 1, F), jnp.float32)
    for i, (w, b) in enumerate(params):
        in_f, out_f = w.shape
        assert b.shape == (out_f,)
        w_stack = w_stack.at[i, :in_f, :out_f].set(w.astype(jnp.bfloat16))
        b_stack = b_stack.at[i, 0, :out_f].set(b.astype(jnp.float32))

    flops = 2 * B_pad * F * F * num_layers
    bytes_accessed = (x_pad.size * 4 + w_stack.size * 2 + b_stack.size * 4
                      + B_pad * F * 4)

    kernel = functools.partial(_mlp_kernel, num_layers=num_layers)

    out_pad = pl.pallas_call(
        kernel,
        out_shape=jax.ShapeDtypeStruct((B_pad, F), jnp.float32),
        grid=grid,
        in_specs=[
            # Activations: one (tile_b, F) block per grid step (pipelined).
            pl.BlockSpec((tile_b, F), lambda i: (i, 0)),
            # Weights/biases: full arrays, constant index_map -> VMEM-resident,
            # not re-fetched across batch tiles.
            pl.BlockSpec((num_layers, F, F), lambda i: (0, 0, 0)),
            pl.BlockSpec((num_layers, 1, F), lambda i: (0, 0, 0)),
        ],
        out_specs=pl.BlockSpec((tile_b, F), lambda i: (i, 0)),
        compiler_params=pltpu.CompilerParams(
            dimension_semantics=("parallel",),   # megacore sharding on v7x
        ),
        cost_estimate=pl.CostEstimate(
            flops=flops,
            transcendentals=B_pad * F,
            bytes_accessed=bytes_accessed,
        ),
    )(x_pad, w_stack, b_stack)

    # Strip batch padding and the 128-lane feature padding (padded cols = 0.5).
    return out_pad[:B, :out_last]


def init_params(key, layer_sizes):
    """Deterministic init mimicking nn.Linear's uniform(-1/sqrt(in), 1/sqrt(in))."""
    params = []
    for in_f, out_f in zip(layer_sizes[:-1], layer_sizes[1:]):
        key, kw, kb = jax.random.split(key, 3)
        bound = 1.0 / jnp.sqrt(jnp.float32(in_f))
        w = jax.random.uniform(kw, (in_f, out_f), jnp.float32, -bound, bound)
        b = jax.random.uniform(kb, (out_f,), jnp.float32, -bound, bound)
        params.append((w, b))
    return params


if __name__ == "__main__":
    # Config consistent with NeralNet.__init__:
    #   cfg.fcLayers = 3, cfg.inputLen = 32, cfg.fcNodes = [64, 48], cfg.numLabels = 8
    layer_sizes = [32, 64, 48, 8]
    batch = 16

    key = jax.random.PRNGKey(0)
    key, kx = jax.random.split(key)
    x = jax.random.normal(kx, (batch, layer_sizes[0]), jnp.float32)
    params = init_params(key, layer_sizes)

    out = neral_net_forward(params, x)
    out = jax.block_until_ready(out)
    assert out.shape == (batch, layer_sizes[-1])

    # Reference 1: identical bf16-input / f32-accum math (tight kernel check).
    ref_bf16 = x
    for i, (w, b) in enumerate(params):
        ref_bf16 = jnp.dot(ref_bf16.astype(jnp.bfloat16), w.astype(jnp.bfloat16),
                           preferred_element_type=jnp.float32) + b
        if i < len(params) - 1:
            ref_bf16 = jnp.maximum(ref_bf16, 0.0)
    ref_bf16 = jax.nn.sigmoid(ref_bf16)
    assert jnp.allclose(out, ref_bf16, atol=1e-4, rtol=1e-4)

    # Reference 2: pure f32 forward (semantic fidelity; loose due to bf16 MXU inputs).
    ref_f32 = x
    for i, (w, b) in enumerate(params):
        ref_f32 = ref_f32 @ w + b
        if i < len(params) - 1:
            ref_f32 = jnp.maximum(ref_f32, 0.0)
    ref_f32 = jax.nn.sigmoid(ref_f32)
    assert jnp.allclose(out, ref_f32, atol=5e-2, rtol=5e-2)

    print("KERNEL_OK")
</pallas_src>

<mosaic_0001>
module attributes {stable_mosaic.version = 11 : i64} {
  func.func @_mlp_kernel(%arg0: i32, %arg1: memref<16x128xf32, #tpu.memory_space<vmem>>, %arg2: memref<3x128x128xbf16, #tpu.memory_space<vmem>>, %arg3: memref<3x1x128xf32, #tpu.memory_space<vmem>>, %arg4: memref<16x128xf32, #tpu.memory_space<vmem>>) attributes {dimension_semantics = [#tpu.dimension_semantics<parallel>], iteration_bounds = array<i64: 1>, scalar_prefetch = 0 : i64, scratch_operands = 0 : i64, tpu.core_type = #tpu.core_type<tc>, window_params = [{transform_indices = @transform_0, window_bounds = array<i64: 16, 128>}, {pipeline_mode = #tpu.pipeline_mode<synchronous>, transform_indices = @transform_1, window_bounds = array<i64: 3, 128, 128>}, {pipeline_mode = #tpu.pipeline_mode<synchronous>, transform_indices = @transform_2, window_bounds = array<i64: 3, 1, 128>}, {transform_indices = @transform_3, window_bounds = array<i64: 16, 128>}]} {
    %c0 = arith.constant 0 : index
    %c0_0 = arith.constant 0 : index
    %0 = vector.load %arg1[%c0, %c0_0] : memref<16x128xf32, #tpu.memory_space<vmem>>, vector<16x128xf32>
    %c0_1 = arith.constant 0 : index
    %c0_2 = arith.constant 0 : index
    %c0_3 = arith.constant 0 : index
    %1 = vector.load %arg2[%c0_1, %c0_2, %c0_3] : memref<3x128x128xbf16, #tpu.memory_space<vmem>>, vector<1x128x128xbf16>
    %2 = vector.shape_cast %1 : vector<1x128x128xbf16> to vector<128x128xbf16>
    %c0_4 = arith.constant 0 : index
    %c0_5 = arith.constant 0 : index
    %c0_6 = arith.constant 0 : index
    %3 = vector.load %arg3[%c0_4, %c0_5, %c0_6] : memref<3x1x128xf32, #tpu.memory_space<vmem>>, vector<1x1x128xf32>
    %4 = vector.shape_cast %3 : vector<1x1x128xf32> to vector<1x128xf32>
    %5 = arith.truncf %0 : vector<16x128xf32> to vector<16x128xbf16>
    %cst = arith.constant dense<0.000000e+00> : vector<16x128xf32>
    %6 = tpu.matmul %5, %2, %cst {dimension_numbers = #tpu.dot_dimension_numbers<[1], [0], [0], [1], [0, 0, 1, 1], [], []>} : vector<16x128xbf16>, vector<128x128xbf16>, vector<16x128xf32> -> vector<16x128xf32>
    %7 = vector.broadcast %4 : vector<1x128xf32> to vector<16x128xf32>
    %8 = arith.addf %6, %7 : vector<16x128xf32>
    %cst_7 = arith.constant 0.000000e+00 : f32
    %9 = vector.broadcast %cst_7 : f32 to vector<16x128xf32>
    %10 = arith.maximumf %8, %9 : vector<16x128xf32>
    %c1 = arith.constant 1 : index
    %c0_8 = arith.constant 0 : index
    %c0_9 = arith.constant 0 : index
    %11 = vector.load %arg2[%c1, %c0_8, %c0_9] : memref<3x128x128xbf16, #tpu.memory_space<vmem>>, vector<1x128x128xbf16>
    %12 = vector.shape_cast %11 : vector<1x128x128xbf16> to vector<128x128xbf16>
    %c1_10 = arith.constant 1 : index
    %c0_11 = arith.constant 0 : index
    %c0_12 = arith.constant 0 : index
    %13 = vector.load %arg3[%c1_10, %c0_11, %c0_12] : memref<3x1x128xf32, #tpu.memory_space<vmem>>, vector<1x1x128xf32>
    %14 = vector.shape_cast %13 : vector<1x1x128xf32> to vector<1x128xf32>
    %15 = arith.truncf %10 : vector<16x128xf32> to vector<16x128xbf16>
    %cst_13 = arith.constant dense<0.000000e+00> : vector<16x128xf32>
    %16 = tpu.matmul %15, %12, %cst_13 {dimension_numbers = #tpu.dot_dimension_numbers<[1], [0], [0], [1], [0, 0, 1, 1], [], []>} : vector<16x128xbf16>, vector<128x128xbf16>, vector<16x128xf32> -> vector<16x128xf32>
    %17 = vector.broadcast %14 : vector<1x128xf32> to vector<16x128xf32>
    %18 = arith.addf %16, %17 : vector<16x128xf32>
    %cst_14 = arith.constant 0.000000e+00 : f32
    %19 = vector.broadcast %cst_14 : f32 to vector<16x128xf32>
    %20 = arith.maximumf %18, %19 : vector<16x128xf32>
    %c2 = arith.constant 2 : index
    %c0_15 = arith.constant 0 : index
    %c0_16 = arith.constant 0 : index
    %21 = vector.load %arg2[%c2, %c0_15, %c0_16] : memref<3x128x128xbf16, #tpu.memory_space<vmem>>, vector<1x128x128xbf16>
    %22 = vector.shape_cast %21 : vector<1x128x128xbf16> to vector<128x128xbf16>
    %c2_17 = arith.constant 2 : index
    %c0_18 = arith.constant 0 : index
    %c0_19 = arith.constant 0 : index
    %23 = vector.load %arg3[%c2_17, %c0_18, %c0_19] : memref<3x1x128xf32, #tpu.memory_space<vmem>>, vector<1x1x128xf32>
    %24 = vector.shape_cast %23 : vector<1x1x128xf32> to vector<1x128xf32>
    %25 = arith.truncf %20 : vector<16x128xf32> to vector<16x128xbf16>
    %cst_20 = arith.constant dense<0.000000e+00> : vector<16x128xf32>
    %26 = tpu.matmul %25, %22, %cst_20 {dimension_numbers = #tpu.dot_dimension_numbers<[1], [0], [0], [1], [0, 0, 1, 1], [], []>} : vector<16x128xbf16>, vector<128x128xbf16>, vector<16x128xf32> -> vector<16x128xf32>
    %27 = vector.broadcast %24 : vector<1x128xf32> to vector<16x128xf32>
    %28 = arith.addf %26, %27 : vector<16x128xf32>
    %29 = arith.negf %28 : vector<16x128xf32>
    %30 = math.exp %29 : vector<16x128xf32>
    %cst_21 = arith.constant 1.000000e+00 : f32
    %31 = vector.broadcast %cst_21 : f32 to vector<16x128xf32>
    %32 = arith.addf %31, %30 : vector<16x128xf32>
    %33 = arith.divf %31, %32 : vector<16x128xf32>
    %c0_22 = arith.constant 0 : index
    %c0_23 = arith.constant 0 : index
    %34 = vector.load %arg4[%c0_22, %c0_23] : memref<16x128xf32, #tpu.memory_space<vmem>>, vector<16x128xf32>
    tpu.vector_store %arg4[%c0_22, %c0_23], %33 {strides = array<i32>} : memref<16x128xf32, #tpu.memory_space<vmem>>, vector<16x128xf32>,
    return
  }
  func.func @transform_0(%arg0: i32) -> (i32, i32) {
    %c0_i32 = arith.constant 0 : i32
    %c0_i32_0 = arith.constant 0 : i32
    return %arg0, %c0_i32 : i32, i32
  }
  func.func @transform_1(%arg0: i32) -> (i32, i32, i32) {
    %c0_i32 = arith.constant 0 : i32
    %c0_i32_0 = arith.constant 0 : i32
    %c0_i32_1 = arith.constant 0 : i32
    %c0_i32_2 = arith.constant 0 : i32
    return %c0_i32, %c0_i32_0, %c0_i32_1 : i32, i32, i32
  }
  func.func @transform_2(%arg0: i32) -> (i32, i32, i32) {
    %c0_i32 = arith.constant 0 : i32
    %c0_i32_0 = arith.constant 0 : i32
    %c0_i32_1 = arith.constant 0 : i32
    %c0_i32_2 = arith.constant 0 : i32
    return %c0_i32, %c0_i32_0, %c0_i32_1 : i32, i32, i32
  }
  func.func @transform_3(%arg0: i32) -> (i32, i32) {
    %c0_i32 = arith.constant 0 : i32
    %c0_i32_0 = arith.constant 0 : i32
    return %arg0, %c0_i32 : i32, i32
  }
}

</mosaic_0001>

<bundles_post_ra>
// kernel: tpu_custom_call.1
= control target key start
LH: loop header
LB: loop body
LE: loop exit
PB: predicated region body
PF: predicated region fallthrough
CT: control target
= control target key end

     0   :  { %8 = vsyncpa [#allocation3], 0  ;;  %s766_s0 = inlined_call_operand.hbm [shape: f32[16,128], index: 0, kind: input, shape index: {}]   ;;  %s767_s1 = inlined_call_operand.hbm [shape: bf16[3,128,128], index: 1, kind: input, shape index: {}]   ;;  %s768_s2 = inlined_call_operand.vmem [shape: f32[3,1,128], index: 2, kind: input, shape index: {}]   ;;  %s769_s3 = inlined_call_operand.hbm [shape: f32[16,128], index: 3, kind: output, shape index: {}]  }
   0x1   :  { %9 = vsyncpa [#allocation6], 0 }
   0x2   :  { %10 = vsyncpa [#allocation4], 0  ;;  %s656_s12 = smov [#allocation2]   ;;  %s584_s16 = scalar_lea.hbm %s766_s0, 256 }
   0x3   :  { %s16_s13 = sshll.u32 %s656_s12, 4  ;;  %p585_p0 = scmp.ne.s32.totalorder %s766_s0, %s584_s16  ;;  %s17_s13 = int_to_ptr.vmem [resolvable:$true] %s16_s13 }
   0x4   :  { %p588_p1 = scmp.lt.u32.totalorder %s584_s16, %s766_s0 }
   0x6   :  { %p590_p2 = pnand %p588_p1, %p585_p0 }
   0x8   :  { %593 = shalt.err (!%p590_p2)
}
   0x9   :  { %s594_s21 = scalar_lea.vmem %s17_s13, 256  ;;  %p599_p4 = scmp.lt.s32.totalorder %s17_s13, %s17_s13 }
   0xa   :  { %p595_p3 = scmp.ne.s32.totalorder %s17_s13, %s594_s21  ;;  %p600_p5 = scmp.lt.s32.totalorder %s594_s21, %s594_s21 }
   0xc   :  { %p601_p6 = por %p600_p5, %p599_p4 }
   0xe   :  { %p602_p7 = pnand %p601_p6, %p595_p3 }
  0x10   :  { %605 = shalt.err (!%p602_p7)
}
  0x11   :  { %s657_s22 = smov 128   ;;  %s658_s23 = smov 8  }
  0x12   :  { %22 = dma.hbm_to_vmem [thread:$0]  %s766_s0, 256, %s17_s13, [#allocation3], %s657_s22, %s657_s22, %s658_s23  }
  0x13   :  { %s659_s26 = smov [#allocation5]   ;;  %s606_s30 = scalar_lea.hbm %s767_s1, 3072 }
  0x14   :  { %s28_s27 = sshll.u32 %s659_s26, 4  ;;  %p607_p8 = scmp.ne.s32.totalorder %s767_s1, %s606_s30  ;;  %s29_s27 = int_to_ptr.vmem [resolvable:$true] %s28_s27 }
  0x15   :  { %p610_p9 = scmp.lt.u32.totalorder %s606_s30, %s767_s1 }
  0x17   :  { %p612_p10 = pnand %p610_p9, %p607_p8 }
  0x19   :  { %615 = shalt.err (!%p612_p10)
}
  0x1a   :  { %s616_s8 = scalar_lea.vmem %s29_s27, 3072  ;;  %p621_p12 = scmp.lt.s32.totalorder %s29_s27, %s29_s27 }
  0x1b   :  { %p617_p11 = scmp.ne.s32.totalorder %s29_s27, %s616_s8  ;;  %p622_p13 = scmp.lt.s32.totalorder %s616_s8, %s616_s8 }
  0x1d   :  { %p623_p0 = por %p622_p13, %p621_p12 }
  0x1f   :  { %p624_p1 = pnand %p623_p0, %p617_p11 }
  0x21   :  { %627 = shalt.err (!%p624_p1)
}
  0x22   :  { %s660_s0 = smov 64   ;;  %s661_s9 = smov 4  }
  0x23   :  { %34 = dma.hbm_to_vmem [thread:$0]  %s767_s1, 3072, %s29_s27, [#allocation6], %s660_s0, %s660_s0, %s661_s9  }
  0x24   :  { %650 = dma.done.wait [#allocation3], 256  }
  0x25   :  { %651 = vsyncadd [#allocation3], 4294967040 }
  0x26   :  { %652 = dma.done.wait [#allocation6], 3072  }
  0x27   :  { %653 = vsyncadd [#allocation6], 4294964224  ;;  %v662_v0 = vmov 0.0   ;;  %vm663_vm0 = vmmov 0   ;;  %v552_v1 = vld [vmem:[#allocation5] sm:$0xff]   ;;  %v553_v2 = vld [vmem:[#allocation5 + $0x8] sm:$0xff]  }
  0x28   :  { %483 = vmatprep.subr.bf16.mxu0 %v662_v0  ;;  %499 = vmatprep.mubr.msk.bf16.mxu0 %vm663_vm0, %v662_v0  ;;  %v554_v3 = vld [vmem:[#allocation5 + $0x10] sm:$0xff]   ;;  %v560_v4 = vld [vmem:[#allocation5 + $0x40] sm:$0xff]   ;;  %v555_v5 = vld [vmem:[#allocation5 + $0x18] sm:$0xff]   ;;  %s664_s17 = smov [#allocation7]  }
  0x29   :  { %503 = vmatprep.subr.bf16.mxu1 %v662_v0  ;;  %519 = vmatprep.mubr.msk.bf16.mxu1 %vm663_vm0, %v662_v0  ;;  %v561_v6 = vld [vmem:[#allocation5 + $0x48] sm:$0xff]   ;;  %v556_v7 = vld [vmem:[#allocation5 + $0x20] sm:$0xff]   ;;  %v562_v8 = vld [vmem:[#allocation5 + $0x50] sm:$0xff]   ;;  %s412_s18 = sshll.u32 %s664_s17, 4  ;;  %s413_s18 = int_to_ptr.vmem [resolvable:$true] %s412_s18 }
  0x2a   :  { %484 = vmatpush3.bf16.msra.mxu0 %v552_v1  ;;  %504 = vmatpush3.bf16.msra.mxu1 %v560_v4  ;;  %v557_v9 = vld [vmem:[#allocation5 + $0x28] sm:$0xff]   ;;  %v563_v10 = vld [vmem:[#allocation5 + $0x58] sm:$0xff]   ;;  %v558_v11 = vld [vmem:[#allocation5 + $0x30] sm:$0xff]   ;;  %p633_p3 = scmp.lt.s32.totalorder %s413_s18, %s413_s18 }
  0x2b   :  { %485 = vmatprep.subr.bf16.mxu0 %v662_v0  ;;  %505 = vmatprep.subr.bf16.mxu1 %v662_v0  ;;  %v564_v12 = vld [vmem:[#allocation5 + $0x60] sm:$0xff]   ;;  %v559_v13 = vld [vmem:[#allocation5 + $0x38] sm:$0xff]   ;;  %v44_v14 = vld [vmem:[#allocation2] sm:$0xff] }
  0x2c   :  { %v45_v15 = vld [vmem:[#allocation2 + $0x8] sm:$0xff]  ;;  %v565_v16 = vld [vmem:[#allocation5 + $0x68] sm:$0xff]   ;;  %v566_v18 = vld [vmem:[#allocation5 + $0x70] sm:$0xff]  }
  0x2d   :  { %v63_v17 = vpack.c.bf16 %v45_v15, %v44_v14  ;;  %v567_v19 = vld [vmem:[#allocation5 + $0x78] sm:$0xff]   ;;  %v568_v20 = vld [vmem:[#allocation5 + $0x80] sm:$0xff]   ;;  %v569_v21 = vld [vmem:[#allocation5 + $0x88] sm:$0xff]  }
  0x2e   :  { %486 = vmatpush3.bf16.msra.mxu0 %v553_v2  ;;  %506 = vmatpush3.bf16.msra.mxu1 %v561_v6  ;;  %v570_v22 = vld [vmem:[#allocation5 + $0x90] sm:$0xff]   ;;  %v571_v23 = vld [vmem:[#allocation5 + $0x98] sm:$0xff]   ;;  %v572_v24 = vld [vmem:[#allocation5 + $0xa0] sm:$0xff]  }
  0x2f   :  { %487 = vmatprep.subr.bf16.mxu0 %v662_v0  ;;  %507 = vmatprep.subr.bf16.mxu1 %v662_v0  ;;  %v573_v25 = vld [vmem:[#allocation5 + $0xa8] sm:$0xff]   ;;  %v425_v26 = vld [vmem:[%s768_s2] ss:$0 sm:$0xff]  ;;  %v575_v37 = vld [vmem:[#allocation5 + $0xb8] sm:$0xff]  }
  0x30   :  { %v574_v36 = vld [vmem:[#allocation5 + $0xb0] sm:$0xff]  }
  0x31   :  { %v435_v38 = vld [vmem:[%s768_s2 + $0x1] ss:$0 sm:$0xff]  ;;  %v445_v48 = vld [vmem:[%s768_s2 + $0x2] ss:$0 sm:$0xff]  ;;  %s628_s2 = scalar_lea.vmem %s413_s18, 256 }
  0x32   :  { %488 = vmatpush3.bf16.msra.mxu0 %v554_v3  ;;  %508 = vmatpush3.bf16.msra.mxu1 %v562_v8  ;;  %p629_p2 = scmp.ne.s32.totalorder %s413_s18, %s628_s2  ;;  %p634_p4 = scmp.lt.s32.totalorder %s628_s2, %s628_s2 }
  0x33   :  { %489 = vmatprep.subr.bf16.mxu0 %v662_v0  ;;  %509 = vmatprep.subr.bf16.mxu1 %v662_v0 }
  0x34   :  { %p635_p5 = por %p634_p4, %p633_p3 }
  0x36   :  { %490 = vmatpush3.bf16.msra.mxu0 %v555_v5  ;;  %510 = vmatpush3.bf16.msra.mxu1 %v563_v10  ;;  %p636_p6 = pnand %p635_p5, %p629_p2 }
  0x37   :  { %491 = vmatprep.subr.bf16.mxu0 %v662_v0  ;;  %511 = vmatprep.subr.bf16.mxu1 %v662_v0 }
  0x3a   :  { %492 = vmatpush3.bf16.msra.mxu0 %v556_v7  ;;  %512 = vmatpush3.bf16.msra.mxu1 %v564_v12 }
  0x3b   :  { %493 = vmatprep.subr.bf16.mxu0 %v662_v0  ;;  %513 = vmatprep.subr.bf16.mxu1 %v662_v0 }
  0x3e   :  { %494 = vmatpush3.bf16.msra.mxu0 %v557_v9  ;;  %514 = vmatpush3.bf16.msra.mxu1 %v565_v16 }
  0x3f   :  { %495 = vmatprep.subr.bf16.mxu0 %v662_v0  ;;  %515 = vmatprep.subr.bf16.mxu1 %v662_v0 }
  0x42   :  { %496 = vmatpush3.bf16.msra.mxu0 %v558_v11  ;;  %516 = vmatpush3.bf16.msra.mxu1 %v566_v18 }
  0x43   :  { %497 = vmatprep.subr.bf16.mxu0 %v662_v0  ;;  %517 = vmatprep.subr.bf16.mxu1 %v662_v0 }
  0x46   :  { %498 = vmatpush3.bf16.msra.mxu0 %v559_v13  ;;  %518 = vmatpush3.bf16.msra.mxu1 %v567_v19 }
  0x47   :  { %523 = vmatprep.subr.bf16.mxu0 %v662_v0 }
  0x49   :  { %500 = vmatmul.mubr.bf16.vlgmr.msra.gmra.mrb[0].mxu0 %v63_v17 }
  0x4a   :  { %539 = vmatprep.mubr.msk.bf16.mxu0 %vm663_vm0, %v662_v0  ;;  %524 = vmatpush3.bf16.msra.mxu0 %v568_v20 }
  0x4b   :  { %525 = vmatprep.subr.bf16.mxu0 %v662_v0 }
  0x4e   :  { %526 = vmatpush3.bf16.msra.mxu0 %v569_v21 }
  0x4f   :  { %527 = vmatprep.subr.bf16.mxu0 %v662_v0 }
  0x52   :  { %528 = vmatpush3.bf16.msra.mxu0 %v570_v22 }
  0x53   :  { %529 = vmatprep.subr.bf16.mxu0 %v662_v0 }
  0x56   :  { %530 = vmatpush3.bf16.msra.mxu0 %v571_v23 }
  0x57   :  { %531 = vmatprep.subr.bf16.mxu0 %v662_v0 }
  0x5a   :  { %532 = vmatpush3.bf16.msra.mxu0 %v572_v24 }
  0x5b   :  { %533 = vmatprep.subr.bf16.mxu0 %v662_v0 }
  0x5e   :  { %534 = vmatpush3.bf16.msra.mxu0 %v573_v25 }
  0x5f   :  { %535 = vmatprep.subr.bf16.mxu0 %v662_v0 }
  0x62   :  { %536 = vmatpush3.bf16.msra.mxu0 %v574_v36 }
  0x63   :  { %537 = vmatprep.subr.bf16.mxu0 %v662_v0 }
  0x66   :  { %538 = vmatpush3.bf16.msra.mxu0 %v575_v37 }
 0x11c   :  { %v152_v27 = vpop.f32.mrb[0].mxu0 }
 0x11d   :  { %v153_v28 = vadd.f32 %v425_v26, %v152_v27  ;;  %v501_v29 = vpop.f32.mrb[1].mxu0 }
 0x11e   :  { %v155_v30 = vpop.f32.mrb[2].mxu0 }
 0x11f   :  { %v156_v31 = vadd.f32 %v425_v26, %v155_v30  ;;  %v502_v32 = vpop.f32.mrb[3].mxu0  ;;  %v159_v33 = vmax.f32 %v153_v28, 0.0 }
 0x121   :  { %v160_v34 = vmax.f32 %v156_v31, 0.0 }
 0x123   :  { %v180_v35 = vpack.c.bf16 %v160_v34, %v159_v33 }
 0x125   :  { %520 = vmatmul.mubr.bf16.vlgmr.msra.gmra.mrb[0].mxu1 %v180_v35 }
 0x1f8   :  { %v269_v39 = vpop.f32.mrb[0].mxu1 }
 0x1f9   :  { %v270_v40 = vadd.f32 %v435_v38, %v269_v39  ;;  %v521_v41 = vpop.f32.mrb[1].mxu1 }
 0x1fa   :  { %v272_v42 = vpop.f32.mrb[2].mxu1 }
 0x1fb   :  { %v273_v43 = vadd.f32 %v435_v38, %v272_v42  ;;  %v522_v44 = vpop.f32.mrb[3].mxu1  ;;  %v276_v45 = vmax.f32 %v270_v40, 0.0 }
 0x1fd   :  { %v277_v46 = vmax.f32 %v273_v43, 0.0 }
 0x1ff   :  { %v297_v47 = vpack.c.bf16 %v277_v46, %v276_v45 }
 0x201   :  { %540 = vmatmul.mubr.bf16.vlgmr.msra.gmra.mrb[4].mxu0 %v297_v47 }
 0x2d4   :  { %v386_v49 = vpop.f32.mrb[4].mxu0 }
 0x2d5   :  { %v387_v50 = vadd.f32 %v445_v48, %v386_v49  ;;  %v541_v51 = vpop.f32.mrb[5].mxu0 }
 0x2d6   :  { %v389_v52 = vpop.f32.mrb[6].mxu0 }
 0x2d7   :  { %v454_v53 = vmul.f32 -1.442695, %v387_v50  ;;  %v390_v54 = vadd.f32 %v445_v48, %v389_v52  ;;  %v542_v55 = vpop.f32.mrb[7].mxu0 }
 0x2d9   :  { %576 = vpow2.f32 %v454_v53  ;;  %v455_v56 = vmul.f32 -1.442695, %v390_v54 }
 0x2db   :  { %578 = vpow2.f32 %v455_v56 }
 0x2e3   :  { %v577_v57 = vpop.eup %576 }
 0x2e4   :  { %v399_v58 = vadd.f32 1.0, %v577_v57 }
 0x2e5   :  { %v579_v59 = vpop.eup %578 }
 0x2e6   :  { %580 = vrcp.f32 %v399_v58  ;;  %v400_v60 = vadd.f32 1.0, %v579_v59 }
 0x2e8   :  { %582 = vrcp.f32 %v400_v60 }
 0x2f0   :  { %v581_v61 = vpop.eup %580 }
 0x2f1   :  { %405 = vst [vmem:[#allocation7] sm:$0xff] %v581_v61 }
 0x2f2   :  { %v583_v62 = vpop.eup %582 }
 0x2f3   :  { %406 = vst [vmem:[#allocation7 + $0x8] sm:$0xff] %v583_v62 }
 0x2f4   :  { %639 = shalt.err (!%p636_p6)
}
 0x2f5   :  { %s640_s21 = scalar_lea.hbm %s769_s3, 256 }
 0x2f6   :  { %p641_p7 = scmp.ne.s32.totalorder %s769_s3, %s640_s21  ;;  %p644_p8 = scmp.lt.u32.totalorder %s640_s21, %s769_s3 }
 0x2f8   :  { %p646_p9 = pnand %p644_p8, %p641_p7 }
 0x2fa   :  { %649 = shalt.err (!%p646_p9)
}
 0x2fb   :  { %418 = dma.vmem_to_hbm [thread:$0]  %s413_s18, 256, %s769_s3, [#allocation4], %s657_s22, %s657_s22, %s658_s23  }
 0x2fc   :  { %654 = dma.done.wait [#allocation4], 256  }
 0x2fd   :  { %655 = vsyncadd [#allocation4], 4294967040 }
 0x2fe   :  { %422 = vsyncpa [#allocation3], 1 }
 0x2ff   :  { %423 = vsyncpa [#allocation6], 1 }
 0x300   :  { %424 = vsyncpa [#allocation4], 1 }

</bundles_post_ra>
